<compile_context>
chip_gen: v7x
topology: tpu7x:2x2x1
jax: 0.10.0
libtpu: 0.0.40
codegen_flags: <defaults>
</compile_context>

<pallas_src>
import functools

import jax
import jax.numpy as jnp
from jax import lax
from jax.experimental import pallas as pl
from jax.experimental.pallas import tpu as pltpu


def _round_up(x, k):
    return ((x + k - 1) // k) * k


def _cdiv(a, b):
    return -(-a // b)


def _int_pow(x, p):
    """x**p for static non-negative int p via squaring (VPU only, no EUP)."""
    if p == 0:
        return jnp.ones_like(x)
    result = None
    base = x
    while p > 0:
        if p & 1:
            result = base if result is None else result * base
        p >>= 1
        if p:
            base = base * base
    return result


def _tile_and_pad(size, cap, min_tiles=1):
    """Pick a tile (multiple of 128, <= cap) first, then pad `size` up to a
    multiple of it.  Avoids collapsing ragged shapes to 128-wide tiles."""
    s128 = _round_up(max(size, 1), 128)
    nt = max(_cdiv(s128, cap), min_tiles)
    t = _round_up(_cdiv(s128, nt), 128)
    return t, t * nt


def _est_vmem_bytes(t, d_pad, elt_bytes):
    stream = 2 * (t + t) * d_pad * elt_bytes   # double-buffered xTr + x^T tiles
    temps = 4 * t * t * 4                      # Gram / K / weighted f32 temps
    return stream + temps


def _ksvm_kernel(xtr_ref, zt_ref, B_ref, b_ref, out_ref, *,
                 kernel_type, kpar, tn, b_resident):
    j = pl.program_id(1)          # reduction over training-point tiles

    @pl.when(j == 0)
    def _():
        out_ref[...] = jnp.zeros_like(out_ref)

    # Standard (TN, d_pad) @ (d_pad, TM) matmul: contraction on lane axis of
    # the LHS, sublane axis of the pre-transposed RHS -> no XLU transpose.
    G = lax.dot_general(xtr_ref[...], zt_ref[...], (((1,), (0,)), ((), ())),
                        preferred_element_type=jnp.float32)

    if kernel_type == "linear":
        Kt = G
    elif kernel_type in ("poly", "polynomial"):
        base = 1.0 + G
        if float(kpar).is_integer() and kpar >= 0:
            Kt = _int_pow(base, int(kpar))       # VPU multiplies, no EUP
        else:
            Kt = jnp.power(base, kpar)           # matches torch.pow semantics
    else:
        # rbf: wrapper folded -kpar and the row norms into augmented columns,
        # so G already equals -kpar * ||x_i - z_j||^2.
        Kt = jnp.exp(jnp.minimum(G, 0.0))

    if b_resident:
        start = pl.multiple_of(j * tn, tn)
        Bcol = B_ref[pl.ds(start, tn), :]        # (TN, 1) slice of resident B
    else:
        Bcol = B_ref[...]                        # (TN, 1) streamed tile

    # B^T @ K tile: VPU multiply + sublane reduce; padded rows carry B == 0.
    out_ref[...] += jnp.sum(Bcol * Kt, axis=0, keepdims=True)

    @pl.when(j == pl.num_programs(1) - 1)
    def _():
        out_ref[...] += b_ref[0, 0]


def kernelized_svm_forward(xTr, x, B, b, *, kernel_type="rbf", kpar=0.05,
                           tile_m=None, tile_n=None, use_bf16_gram=False,
                           linear_fast_path=True, max_resident_b_rows=8192):
    """Pallas implementation of KernelizedSVM.forward(xTr, x) -> (m,)."""
    n, d = xTr.shape
    m, d2 = x.shape
    assert d == d2, "Input dimensions do not match"
    assert kernel_type in ("linear", "polynomial", "poly", "rbf"), \
        "Kernel type %s not known." % kernel_type

    xTr = jnp.asarray(xTr, jnp.float32)
    x = jnp.asarray(x, jnp.float32)
    Bv = jnp.asarray(B, jnp.float32).reshape(n)
    b_scalar = jnp.asarray(b, jnp.float32).reshape(())

    # Algebraic fast path for the linear kernel:
    #   B^T (xTr x^T) == (B^T xTr) x^T  ->  O((n+m) d) instead of O(n m d).
    if kernel_type == "linear" and linear_fast_path:
        w = Bv @ xTr
        return x @ w + b_scalar

    # ---- build (possibly augmented) operands --------------------------------
    if kernel_type == "rbf":
        # Fold -kpar and the row norms into two augmented columns so the MXU
        # produces -kpar * sqdist directly. Gram stays f32 for rbf (bf16 would
        # suffer catastrophic cancellation in xn + zn - 2G).
        xn = jnp.sum(xTr * xTr, axis=1, keepdims=True)                 # (n, 1)
        zn = jnp.sum(x * x, axis=1, keepdims=True)                     # (m, 1)
        kp = jnp.float32(kpar)
        lhs = jnp.concatenate(
            [2.0 * kp * xTr, -kp * xn, jnp.ones((n, 1), jnp.float32)], axis=1)
        rhs = jnp.concatenate(
            [x, jnp.ones((m, 1), jnp.float32), -kp * zn], axis=1)
        d_aug = d + 2
        elt = jnp.float32
    else:
        lhs, rhs, d_aug = xTr, x, d
        elt = jnp.bfloat16 if use_bf16_gram else jnp.float32

    d_pad = _round_up(d_aug, 128)
    elt_bytes = 2 if elt == jnp.bfloat16 else 4

    # ---- generation-aware tile sizing ----------------------------------------
    try:
        vmem_cap = int(getattr(pltpu.get_tpu_info(), "vmem_capacity_bytes",
                               64 * 1024 * 1024))
    except Exception:  # pragma: no cover - conservative fallback
        vmem_cap = 64 * 1024 * 1024
    vmem_limit = int(vmem_cap * 0.85)            # headroom for Mosaic scratch
    two_tc = vmem_cap <= 64 * 1024 * 1024        # v7x-like: 2 TCs share grid

    cap = 128
    for cand in (1024, 512, 256, 128):
        if _est_vmem_bytes(cand, d_pad, elt_bytes) <= vmem_limit // 2:
            cap = cand
            break
    # TODO(synk): add a d-tiling reduction axis (accumulate G into a (TN,TM)
    # scratch before the nonlinearity) for very large feature dims.

    cap_m = max(128, _round_up(min(tile_m, cap), 128)) if tile_m else cap
    cap_n = max(128, _round_up(min(tile_n, cap), 128)) if tile_n else cap
    min_m_tiles = 2 if (two_tc and _round_up(m, 128) >= 256) else 1
    TM, m_pad = _tile_and_pad(m, cap_m, min_tiles=min_m_tiles)
    TN, n_pad = _tile_and_pad(n, cap_n)

    # ---- pad + layout plumbing in the wrapper (one-time, not per grid step) --
    lhs_p = jnp.pad(lhs.astype(elt), ((0, n_pad - n), (0, d_pad - d_aug)))
    rhs_t = jnp.pad(rhs.astype(elt),
                    ((0, m_pad - m), (0, d_pad - d_aug))).T      # (d_pad, m_pad)
    B_p = jnp.pad(Bv, (0, n_pad - n)).reshape(n_pad, 1)
    b2 = b_scalar.reshape(1, 1)

    b_resident = n_pad <= max_resident_b_rows
    if b_resident:
        b_spec = pl.BlockSpec((n_pad, 1), lambda i, j: (0, 0))   # loaded once
    else:
        b_spec = pl.BlockSpec((TN, 1), lambda i, j: (j, 0))      # streamed

    grid = (m_pad // TM, n_pad // TN)
    kern = functools.partial(_ksvm_kernel, kernel_type=kernel_type, kpar=kpar,
                             tn=TN, b_resident=b_resident)

    out = pl.pallas_call(
        kern,
        out_shape=jax.ShapeDtypeStruct((1, m_pad), jnp.float32),
        grid=grid,
        in_specs=[
            pl.BlockSpec((TN, d_pad), lambda i, j: (j, 0)),      # xTr (aug) tile
            pl.BlockSpec((d_pad, TM), lambda i, j: (0, i)),      # x^T (aug) tile
            b_spec,                                              # B weights
            pl.BlockSpec(memory_space=pltpu.MemorySpace.SMEM),   # bias scalar
        ],
        out_specs=pl.BlockSpec((1, TM), lambda i, j: (0, i)),
        compiler_params=pltpu.CompilerParams(
            dimension_semantics=("parallel", "arbitrary"),
            vmem_limit_bytes=vmem_limit,
        ),
    )(lhs_p, rhs_t, B_p, b2)

    return out[0, :m]


def _reference_forward(xTr, x, B, b, kernel_type="rbf", kpar=0.05):
    """Pure-JAX reference mirroring the PyTorch code."""
    G = xTr @ x.T
    if kernel_type == "linear":
        K = G
    elif kernel_type in ("poly", "polynomial"):
        if float(kpar).is_integer() and kpar >= 0:
            K = (1.0 + G) ** int(kpar)
        else:
            K = jnp.power(1.0 + G, kpar)
    elif kernel_type == "rbf":
        sq = (jnp.sum(xTr * xTr, 1)[:, None] + jnp.sum(x * x, 1)[None, :]
              - 2.0 * G)
        K = jnp.exp(-kpar * jnp.maximum(sq, 0.0))
    else:
        K = jnp.ones_like(G)
    return B @ K + b


if __name__ == "__main__":
    key = jax.random.PRNGKey(0)
    k_xtr, k_x, k_B, k_b = jax.random.split(key, 4)

    # Small demo consistent with KernelizedSVM(dim=n, 'rbf', kpar=0.05).
    n, m, d = 8, 8, 32
    kpar = 0.05
    xTr = jax.random.normal(k_xtr, (n, d), dtype=jnp.float32)
    x = jax.random.normal(k_x, (m, d), dtype=jnp.float32)
    B = jax.random.normal(k_B, (n,), dtype=jnp.float32)
    b = jax.random.normal(k_b, (1,), dtype=jnp.float32)[0]

    out = jax.block_until_ready(
        kernelized_svm_forward(xTr, x, B, b, kernel_type="rbf", kpar=kpar))
    ref = _reference_forward(xTr, x, B, b, kernel_type="rbf", kpar=kpar)
    assert out.shape == (m,)
    assert jnp.allclose(out, ref, atol=1e-4, rtol=1e-4), (out, ref)

    # Linear kernel: algebraic fast path and the general Pallas path.
    r_lin = _reference_forward(xTr, x, B, b, kernel_type="linear")
    o_lin_fast = jax.block_until_ready(
        kernelized_svm_forward(xTr, x, B, b, kernel_type="linear"))
    o_lin_pal = jax.block_until_ready(
        kernelized_svm_forward(xTr, x, B, b, kernel_type="linear",
                               linear_fast_path=False))
    assert jnp.allclose(o_lin_fast, r_lin, atol=1e-3, rtol=1e-4)
    assert jnp.allclose(o_lin_pal, r_lin, atol=1e-3, rtol=1e-4)

    # Integer-degree polynomial kernel via the Pallas path.
    o_poly = jax.block_until_ready(
        kernelized_svm_forward(xTr, x, B, b, kernel_type="poly", kpar=3))
    r_poly = _reference_forward(xTr, x, B, b, kernel_type="poly", kpar=3)
    assert jnp.allclose(o_poly, r_poly, atol=1e-3, rtol=1e-4)

    # Larger ragged shapes with small tile caps: multi-tile (m, n) grid,
    # cross-tile accumulation into the resident output block, zero padding,
    # resident-B and streamed-B paths.
    k1, k2, k3, k4 = jax.random.split(jax.random.PRNGKey(1), 4)
    n2, m2, d2 = 300, 260, 72
    xTr2 = jax.random.normal(k1, (n2, d2), dtype=jnp.float32)
    x2 = jax.random.normal(k2, (m2, d2), dtype=jnp.float32)
    B2 = jax.random.normal(k3, (n2,), dtype=jnp.float32)
    b2 = jax.random.normal(k4, (1,), dtype=jnp.float32)[0]
    r2 = _reference_forward(xTr2, x2, B2, b2, kernel_type="rbf", kpar=0.05)
    o2 = jax.block_until_ready(
        kernelized_svm_forward(xTr2, x2, B2, b2, kernel_type="rbf", kpar=0.05,
                               tile_m=128, tile_n=128))
    assert o2.shape == (m2,)
    assert jnp.allclose(o2, r2, atol=1e-2, rtol=1e-3), (o2, r2)
    o3 = jax.block_until_ready(
        kernelized_svm_forward(xTr2, x2, B2, b2, kernel_type="rbf", kpar=0.05,
                               tile_m=128, tile_n=128, max_resident_b_rows=0))
    assert jnp.allclose(o3, r2, atol=1e-2, rtol=1e-3)

    print("KERNEL_OK")
</pallas_src>

<mosaic_0001>
module attributes {stable_mosaic.version = 11 : i64} {
  func.func @_ksvm_kernel(%arg0: i32, %arg1: i32, %arg2: memref<128x128xf32, #tpu.memory_space<vmem>>, %arg3: memref<128x128xf32, #tpu.memory_space<vmem>>, %arg4: memref<128x1xf32, #tpu.memory_space<vmem>>, %arg5: memref<1x1xf32, #tpu.memory_space<smem>>, %arg6: memref<1x128xf32, #tpu.memory_space<vmem>>) attributes {dimension_semantics = [#tpu.dimension_semantics<parallel>, #tpu.dimension_semantics<arbitrary>], iteration_bounds = array<i64: 1, 1>, scalar_prefetch = 0 : i64, scratch_operands = 0 : i64, tpu.core_type = #tpu.core_type<tc>, window_params = [{transform_indices = @transform_0, window_bounds = array<i64: 128, 128>}, {transform_indices = @transform_1, window_bounds = array<i64: 128, 128>}, {pipeline_mode = #tpu.pipeline_mode<synchronous>, transform_indices = @transform_2, window_bounds = array<i64: 128, 1>}, {transform_indices = @transform_3, window_bounds = array<i64: 1, 1>}, {transform_indices = @transform_4, window_bounds = array<i64: 1, 128>}]} {
    %c0_i32 = arith.constant 0 : i32
    %0 = arith.cmpi eq, %arg1, %c0_i32 : i32
    %1 = arith.extui %0 : i1 to i32
    %c0_i32_0 = arith.constant 0 : i32
    %2 = arith.cmpi ne, %1, %c0_i32_0 : i32
    scf.if %2 {
      %cst_13 = arith.constant 0.000000e+00 : f32
      %23 = vector.broadcast %cst_13 : f32 to vector<1x128xf32>
      %c0_14 = arith.constant 0 : index
      %c0_15 = arith.constant 0 : index
      %24 = vector.load %arg6[%c0_14, %c0_15] : memref<1x128xf32, #tpu.memory_space<vmem>>, vector<1x128xf32>
      tpu.vector_store %arg6[%c0_14, %c0_15], %23 {strides = array<i32>} : memref<1x128xf32, #tpu.memory_space<vmem>>, vector<1x128xf32>,
    } else {
    }
    %c0 = arith.constant 0 : index
    %c0_1 = arith.constant 0 : index
    %3 = vector.load %arg2[%c0, %c0_1] : memref<128x128xf32, #tpu.memory_space<vmem>>, vector<128x128xf32>
    %c0_2 = arith.constant 0 : index
    %c0_3 = arith.constant 0 : index
    %4 = vector.load %arg3[%c0_2, %c0_3] : memref<128x128xf32, #tpu.memory_space<vmem>>, vector<128x128xf32>
    %cst = arith.constant dense<0.000000e+00> : vector<128x128xf32>
    %5 = tpu.matmul %3, %4, %cst {dimension_numbers = #tpu.dot_dimension_numbers<[1], [0], [0], [1], [0, 0, 1, 1], [], []>} : vector<128x128xf32>, vector<128x128xf32>, vector<128x128xf32> -> vector<128x128xf32>
    %cst_4 = arith.constant 0.000000e+00 : f32
    %6 = vector.broadcast %cst_4 : f32 to vector<128x128xf32>
    %7 = arith.minimumf %5, %6 : vector<128x128xf32>
    %8 = math.exp %7 : vector<128x128xf32>
    %c128_i32 = arith.constant 128 : i32
    %9 = arith.muli %arg1, %c128_i32 : i32
    %10 = tpu.assume_multiple %9, 128 : i32
    %11 = arith.index_cast %10 : i32 to index
    %c0_5 = arith.constant 0 : index
    %12 = vector.load %arg4[%11, %c0_5] : memref<128x1xf32, #tpu.memory_space<vmem>>, vector<128x1xf32>
    %c0_6 = arith.constant 0 : index
    %c0_7 = arith.constant 0 : index
    %13 = vector.load %arg6[%c0_6, %c0_7] : memref<1x128xf32, #tpu.memory_space<vmem>>, vector<1x128xf32>
    %14 = vector.broadcast %12 : vector<128x1xf32> to vector<128x128xf32>
    %15 = arith.mulf %14, %8 : vector<128x128xf32>
    %cst_8 = arith.constant dense<0.000000e+00> : vector<128xf32>
    %16 = vector.multi_reduction <add>, %15, %cst_8 [0] : vector<128x128xf32> to vector<128xf32>
    %17 = vector.shape_cast %16 : vector<128xf32> to vector<1x128xf32>
    %18 = arith.addf %13, %17 : vector<1x128xf32>
    %c0_9 = arith.constant 0 : index
    %c0_10 = arith.constant 0 : index
    %19 = vector.load %arg6[%c0_9, %c0_10] : memref<1x128xf32, #tpu.memory_space<vmem>>, vector<1x128xf32>
    tpu.vector_store %arg6[%c0_9, %c0_10], %18 {strides = array<i32>} : memref<1x128xf32, #tpu.memory_space<vmem>>, vector<1x128xf32>,
    %c0_i32_11 = arith.constant 0 : i32
    %20 = arith.cmpi eq, %arg1, %c0_i32_11 : i32
    %21 = arith.extui %20 : i1 to i32
    %c0_i32_12 = arith.constant 0 : i32
    %22 = arith.cmpi ne, %21, %c0_i32_12 : i32
    scf.if %22 {
      %c0_13 = arith.constant 0 : index
      %c0_14 = arith.constant 0 : index
      %23 = vector.load %arg6[%c0_13, %c0_14] : memref<1x128xf32, #tpu.memory_space<vmem>>, vector<1x128xf32>
      %c0_15 = arith.constant 0 : index
      %c0_16 = arith.constant 0 : index
      %24 = memref.load %arg5[%c0_15, %c0_16] : memref<1x1xf32, #tpu.memory_space<smem>>
      %25 = vector.broadcast %24 : f32 to vector<1x128xf32>
      %26 = arith.addf %23, %25 : vector<1x128xf32>
      %c0_17 = arith.constant 0 : index
      %c0_18 = arith.constant 0 : index
      %27 = vector.load %arg6[%c0_17, %c0_18] : memref<1x128xf32, #tpu.memory_space<vmem>>, vector<1x128xf32>
      tpu.vector_store %arg6[%c0_17, %c0_18], %26 {strides = array<i32>} : memref<1x128xf32, #tpu.memory_space<vmem>>, vector<1x128xf32>,
    } else {
    }
    return
  }
  func.func @transform_0(%arg0: i32, %arg1: i32) -> (i32, i32) {
    %c0_i32 = arith.constant 0 : i32
    %c0_i32_0 = arith.constant 0 : i32
    return %arg1, %c0_i32 : i32, i32
  }
  func.func @transform_1(%arg0: i32, %arg1: i32) -> (i32, i32) {
    %c0_i32 = arith.constant 0 : i32
    %c0_i32_0 = arith.constant 0 : i32
    return %c0_i32, %arg0 : i32, i32
  }
  func.func @transform_2(%arg0: i32, %arg1: i32) -> (i32, i32) {
    %c0_i32 = arith.constant 0 : i32
    %c0_i32_0 = arith.constant 0 : i32
    %c0_i32_1 = arith.constant 0 : i32
    return %c0_i32, %c0_i32_0 : i32, i32
  }
  func.func @transform_3(%arg0: i32, %arg1: i32) -> (i32, i32) {
    %c0_i32 = arith.constant 0 : i32
    %c0_i32_0 = arith.constant 0 : i32
    %c0_i32_1 = arith.constant 0 : i32
    return %c0_i32, %c0_i32_0 : i32, i32
  }
  func.func @transform_4(%arg0: i32, %arg1: i32) -> (i32, i32) {
    %c0_i32 = arith.constant 0 : i32
    %c0_i32_0 = arith.constant 0 : i32
    return %c0_i32, %arg0 : i32, i32
  }
}

</mosaic_0001>

<bundles_post_ra>
// kernel: tpu_custom_call.1
= control target key start
LH: loop header
LB: loop body
LE: loop exit
PB: predicated region body
PF: predicated region fallthrough
CT: control target
= control target key end

     0   :  { %10 = vsyncpa [#allocation4], 0  ;;  %s802_s0 = inlined_call_operand.vmem [shape: f32[128,128], index: 0, kind: input, shape index: {}]   ;;  %s803_s1 = inlined_call_operand.hbm [shape: f32[128,128], index: 1, kind: input, shape index: {}]   ;;  %s804_s2 = inlined_call_operand.vmem [shape: f32[128,1], index: 2, kind: input, shape index: {}]   ;;  %s805_s3 = inlined_call_operand.<no memory space> [shape: f32[1,1], index: 3, kind: input, shape index: {}]   ;;  %s806_s4 = inlined_call_operand.hbm [shape: f32[1,128], index: 4, kind: output, shape index: {}]  }
   0x1   :  { %11 = vsyncpa [#allocation5], 0  ;;  %s648_s15 = smov [#allocation3]   ;;  %s600_s19 = scalar_lea.hbm %s803_s1, 2048 }
   0x2   :  { %s19_s16 = sshll.u32 %s648_s15, 4  ;;  %p601_p0 = scmp.ne.s32.totalorder %s803_s1, %s600_s19  ;;  %s20_s16 = int_to_ptr.vmem [resolvable:$true] %s19_s16 }
   0x3   :  { %p604_p1 = scmp.lt.u32.totalorder %s600_s19, %s803_s1 }
   0x5   :  { %p606_p2 = pnand %p604_p1, %p601_p0 }
   0x7   :  { %609 = shalt.err (!%p606_p2)
}
   0x8   :  { %s610_s24 = scalar_lea.vmem %s20_s16, 2048  ;;  %p615_p4 = scmp.lt.s32.totalorder %s20_s16, %s20_s16 }
   0x9   :  { %p611_p3 = scmp.ne.s32.totalorder %s20_s16, %s610_s24  ;;  %p616_p5 = scmp.lt.s32.totalorder %s610_s24, %s610_s24 }
   0xb   :  { %p617_p6 = por %p616_p5, %p615_p4 }
   0xd   :  { %p618_p7 = pnand %p617_p6, %p611_p3 }
   0xf   :  { %621 = shalt.err (!%p618_p7)
}
  0x10   :  { %s649_s25 = smov 128   ;;  %s650_s26 = smov 8  }
  0x11   :  { %25 = dma.hbm_to_vmem [thread:$0]  %s803_s1, 2048, %s20_s16, [#allocation4], %s649_s25, %s649_s25, %s650_s26  }
  0x12   :  { %644 = dma.done.wait [#allocation4], 2048  }
  0x13   :  { %645 = vsyncadd [#allocation4], 4294965248  ;;  %v651_v0 = vmov 0   ;;  %v54_v1 = vld [vmem:[#allocation3] sm:$0xff]  ;;  %v55_v2 = vld [vmem:[#allocation3 + $0x8] sm:$0xff]  ;;  %v652_v57 = vmov 0.0  }
  0x14   :  { %566 = vset.pattern.permute.xlu0 %v651_v0  ;;  %567 = vset.pattern.permute.xlu1 %v651_v0  ;;  %v56_v3 = vld [vmem:[#allocation3 + $0x10] sm:$0xff]  ;;  %v512_v4 = vpack.c.bf16 %v55_v2, %v54_v1  ;;  %v57_v5 = vld [vmem:[#allocation3 + $0x18] sm:$0xff]  ;;  %v58_v7 = vld [vmem:[#allocation3 + $0x20] sm:$0xff]  ;;  %37 = vst [vmem:[#allocation6] sm:$0x1] %v652_v57  ;;  %s653_s12 = smov [#allocation6]  }
  0x15   :  { %v516_v6 = vpack.c.bf16 %v57_v5, %v56_v3  ;;  %v59_v8 = vld [vmem:[#allocation3 + $0x28] sm:$0xff]  ;;  %v38_v10 = vld [vmem:[%s802_s0] sm:$0xff]  ;;  %v60_v12 = vld [vmem:[#allocation3 + $0x30] sm:$0xff]  ;;  %s415_s13 = sshll.u32 %s653_s12, 4  ;;  %s416_s13 = int_to_ptr.vmem [resolvable:$true] %s415_s13 }
  0x16   :  { %513 = vmatprep.subr.bf16.mxu0 %v512_v4  ;;  %544 = vmatprep.subr.bf16.mxu1 %v512_v4  ;;  %v520_v9 = vpack.c.bf16 %v59_v8, %v58_v7  ;;  %v46_v11 = vld [vmem:[%s802_s0 + $0x40] sm:$0xff]  ;;  %v61_v13 = vld [vmem:[#allocation3 + $0x38] sm:$0xff]  ;;  %v63_v16 = vld [vmem:[#allocation3 + $0x48] sm:$0xff]  ;;  %s622_s14 = scalar_lea.vmem %s416_s13, 16  ;;  %s626_s15 = scalar_lea.vmem %s416_s13, 32 }
  0x17   :  { %515 = vmatpush3.bf16.msra.mxu0 %v512_v4  ;;  %552 = vmatpush3.bf16.msra.mxu1 %v512_v4  ;;  %v524_v14 = vpack.c.bf16 %v61_v13, %v60_v12  ;;  %v62_v15 = vld [vmem:[#allocation3 + $0x40] sm:$0xff]  ;;  %v267_v18 = vld [vmem:[%s804_s2 + $0x10] sm:$0xff]  ;;  %v266_v19 = vld [vmem:[%s804_s2 + $0x8] sm:$0xff]  ;;  %p623_p8 = scmp.ne.s32.totalorder %s416_s13, %s622_s14  ;;  %p627_p9 = scmp.lt.s32.totalorder %s416_s13, %s416_s13 }
  0x18   :  { %517 = vmatprep.subr.bf16.mxu0 %v516_v6  ;;  %545 = vmatprep.subr.bf16.mxu1 %v516_v6  ;;  %v265_v17 = vld [vmem:[%s804_s2] sm:$0xff]  ;;  %v528_v20 = vpack.c.bf16 %v63_v16, %v62_v15  ;;  %v64_v21 = vld [vmem:[#allocation3 + $0x50] sm:$0xff]  ;;  %v65_v22 = vld [vmem:[#allocation3 + $0x58] sm:$0xff]  ;;  %p628_p10 = scmp.lt.s32.totalorder %s626_s15, %s622_s14 }
  0x19   :  { %488 = vmatprep.mubr.f32.mxu0 %v38_v10  ;;  %500 = vmatprep.mubr.f32.mxu1 %v46_v11  ;;  %v268_v23 = vld [vmem:[%s804_s2 + $0x18] sm:$0xff]  ;;  %v269_v24 = vld [vmem:[%s804_s2 + $0x20] sm:$0xff]  ;;  %v532_v25 = vpack.c.bf16 %v65_v22, %v64_v21  ;;  %v67_v27 = vld [vmem:[#allocation3 + $0x68] sm:$0xff] }
  0x1a   :  { %284 = vperm.xlu0 %566, %v265_v17   ;;  %294 = vperm.xlu1 %567, %v267_v18   ;;  %v66_v26 = vld [vmem:[#allocation3 + $0x60] sm:$0xff]  ;;  %v270_v28 = vld [vmem:[%s804_s2 + $0x28] sm:$0xff]  ;;  %v271_v29 = vld [vmem:[%s804_s2 + $0x30] sm:$0xff]  ;;  %p629_p11 = por %p628_p10, %p627_p9 }
  0x1b   :  { %519 = vmatpush3.bf16.msra.mxu0 %v516_v6  ;;  %553 = vmatpush3.bf16.msra.mxu1 %v516_v6  ;;  %v536_v30 = vpack.c.bf16 %v67_v27, %v66_v26  ;;  %v68_v31 = vld [vmem:[#allocation3 + $0x70] sm:$0xff]  ;;  %v69_v32 = vld [vmem:[#allocation3 + $0x78] sm:$0xff]  ;;  %v273_v34 = vld [vmem:[%s804_s2 + $0x40] sm:$0xff] }
  0x1c   :  { %521 = vmatprep.subr.bf16.mxu0 %v520_v9  ;;  %546 = vmatprep.subr.bf16.mxu1 %v520_v9  ;;  %v272_v33 = vld [vmem:[%s804_s2 + $0x38] sm:$0xff]  ;;  %v540_v35 = vpack.c.bf16 %v69_v32, %v68_v31  ;;  %v274_v36 = vld [vmem:[%s804_s2 + $0x48] sm:$0xff]  ;;  %v275_v37 = vld [vmem:[%s804_s2 + $0x50] sm:$0xff]  ;;  %p630_p12 = pnand %p629_p11, %p623_p8 }
  0x1d   :  { %v276_v38 = vld [vmem:[%s804_s2 + $0x58] sm:$0xff]  ;;  %v39_v39 = vld [vmem:[%s802_s0 + $0x8] sm:$0xff]  ;;  %v40_v41 = vld [vmem:[%s802_s0 + $0x10] sm:$0xff] }
  0x1e   :  { %289 = vperm.xlu0 %566, %v266_v19   ;;  %299 = vperm.xlu1 %567, %v268_v23   ;;  %v47_v40 = vld [vmem:[%s802_s0 + $0x48] sm:$0xff]  ;;  %v48_v42 = vld [vmem:[%s802_s0 + $0x50] sm:$0xff]  ;;  %v277_v43 = vld [vmem:[%s804_s2 + $0x60] sm:$0xff] }
  0x1f   :  { %523 = vmatpush3.bf16.msra.mxu0 %v520_v9  ;;  %554 = vmatpush3.bf16.msra.mxu1 %v520_v9  ;;  %v278_v44 = vld [vmem:[%s804_s2 + $0x68] sm:$0xff]  ;;  %v41_v45 = vld [vmem:[%s802_s0 + $0x18] sm:$0xff]  ;;  %v42_v47 = vld [vmem:[%s802_s0 + $0x20] sm:$0xff] }
  0x20   :  { %525 = vmatprep.subr.bf16.mxu0 %v524_v14  ;;  %547 = vmatprep.subr.bf16.mxu1 %v524_v14  ;;  %v49_v46 = vld [vmem:[%s802_s0 + $0x58] sm:$0xff]  ;;  %v50_v48 = vld [vmem:[%s802_s0 + $0x60] sm:$0xff]  ;;  %v279_v49 = vld [vmem:[%s804_s2 + $0x70] sm:$0xff] }
  0x21   :  { %v280_v50 = vld [vmem:[%s804_s2 + $0x78] sm:$0xff]  ;;  %v43_v51 = vld [vmem:[%s802_s0 + $0x28] sm:$0xff]  ;;  %v44_v53 = vld [vmem:[%s802_s0 + $0x30] sm:$0xff] }
  0x22   :  { %304 = vperm.xlu0 %566, %v269_v24   ;;  %309 = vperm.xlu1 %567, %v270_v28   ;;  %v51_v52 = vld [vmem:[%s802_s0 + $0x68] sm:$0xff]  ;;  %v52_v54 = vld [vmem:[%s802_s0 + $0x70] sm:$0xff]  ;;  %v45_v55 = vld [vmem:[%s802_s0 + $0x38] sm:$0xff] }
  0x23   :  { %527 = vmatpush3.bf16.msra.mxu0 %v524_v14  ;;  %555 = vmatpush3.bf16.msra.mxu1 %v524_v14  ;;  %v53_v56 = vld [vmem:[%s802_s0 + $0x78] sm:$0xff] }
  0x24   :  { %529 = vmatprep.subr.bf16.mxu0 %v528_v20  ;;  %548 = vmatprep.subr.bf16.mxu1 %v528_v20 }
  0x26   :  { %314 = vperm.xlu0 %566, %v271_v29   ;;  %319 = vperm.xlu1 %567, %v272_v33  }
  0x27   :  { %531 = vmatpush3.bf16.msra.mxu0 %v528_v20  ;;  %556 = vmatpush3.bf16.msra.mxu1 %v528_v20 }
  0x28   :  { %533 = vmatprep.subr.bf16.mxu0 %v532_v25  ;;  %549 = vmatprep.subr.bf16.mxu1 %v532_v25 }
  0x2a   :  { %324 = vperm.xlu0 %566, %v273_v34   ;;  %329 = vperm.xlu1 %567, %v274_v36  }
  0x2b   :  { %535 = vmatpush3.bf16.msra.mxu0 %v532_v25  ;;  %557 = vmatpush3.bf16.msra.mxu1 %v532_v25 }
  0x2c   :  { %537 = vmatprep.subr.bf16.mxu0 %v536_v30  ;;  %550 = vmatprep.subr.bf16.mxu1 %v536_v30 }
  0x2e   :  { %334 = vperm.xlu0 %566, %v275_v37   ;;  %339 = vperm.xlu1 %567, %v276_v38  }
  0x2f   :  { %539 = vmatpush3.bf16.msra.mxu0 %v536_v30  ;;  %558 = vmatpush3.bf16.msra.mxu1 %v536_v30 }
  0x30   :  { %541 = vmatprep.subr.bf16.mxu0 %v540_v35  ;;  %551 = vmatprep.subr.bf16.mxu1 %v540_v35 }
  0x32   :  { %344 = vperm.xlu0 %566, %v277_v43   ;;  %349 = vperm.xlu1 %567, %v278_v44  }
  0x33   :  { %543 = vmatpush3.bf16.msra.mxu0 %v540_v35  ;;  %559 = vmatpush3.bf16.msra.mxu1 %v540_v35 }
  0x36   :  { %489 = vmatmul.mubr.f32.vlgmr.msra.gmra.mrb[0].mxu0 %v39_v39  ;;  %501 = vmatmul.mubr.f32.vlgmr.msra.gmra.mrb[0].mxu1 %v47_v40 }
  0x37   :  { %491 = vmatprep.mubr.f32.mxu0 %v40_v41  ;;  %503 = vmatprep.mubr.f32.mxu1 %v48_v42 }
  0x38   :  { %354 = vperm.xlu0 %566, %v279_v49   ;;  %359 = vperm.xlu1 %567, %v280_v50  }
  0x3a   :  { %492 = vmatmul.mubr.f32.gmra.mrb[2].mxu0 %v41_v45  ;;  %504 = vmatmul.mubr.f32.gmra.mrb[2].mxu1 %v49_v46 }
  0x3b   :  { %494 = vmatprep.mubr.f32.mxu0 %v42_v47  ;;  %506 = vmatprep.mubr.f32.mxu1 %v50_v48 }
  0x3e   :  { %495 = vmatmul.mubr.f32.gmra.mrb[4].mxu0 %v43_v51  ;;  %507 = vmatmul.mubr.f32.gmra.mrb[4].mxu1 %v51_v52 }
  0x3f   :  { %497 = vmatprep.mubr.f32.mxu0 %v44_v53  ;;  %509 = vmatprep.mubr.f32.mxu1 %v52_v54 }
  0x42   :  { %498 = vmatmul.mubr.f32.gmra.mrb[6].mxu0 %v45_v55  ;;  %510 = vmatmul.mubr.f32.gmra.mrb[6].mxu1 %v53_v56 }
  0x99   :  { %v285_v58 = vpop.permute.xlu0 %284  ;;  %v295_v1 = vpop.permute.xlu1 %294 }
  0x9d   :  { %v290_v10 = vpop.permute.xlu0 %289  ;;  %v300_v19 = vpop.permute.xlu1 %299 }
  0xa1   :  { %v305_v30 = vpop.permute.xlu0 %304  ;;  %v310_v36 = vpop.permute.xlu1 %309 }
  0xa5   :  { %v315_v45 = vpop.permute.xlu0 %314  ;;  %v320_v49 = vpop.permute.xlu1 %319 }
 0x109   :  { %v490_v59 = vpop.f32.mrb[0].mxu0  ;;  %v502_v60 = vpop.f32.mrb[0].mxu1 }
 0x10a   :  { %v216_v61 = vmin.f32 %v490_v59, 0.0  ;;  %v136_v62 = vpop.f32.mrb[1].mxu0  ;;  %v176_v63 = vpop.f32.mrb[1].mxu1  ;;  %v224_v31 = vmin.f32 %v502_v60, 0.0 }
 0x10b   :  { %v215_v0 = vmin.f32 %v136_v62, 0.0  ;;  %v223_v24 = vmin.f32 %v176_v63, 0.0  ;;  %v325_v60 = vpop.permute.xlu0 %324 }
 0x10c   :  { %v233_v2 = vmul.f32 1.442695, %v216_v61  ;;  %v249_v40 = vmul.f32 1.442695, %v224_v31 }
 0x10d   :  { %v231_v3 = vmul.f32 1.442695, %v215_v0  ;;  %v493_v4 = vpop.f32.mrb[2].mxu0  ;;  %v505_v5 = vpop.f32.mrb[2].mxu1  ;;  %v247_v37 = vmul.f32 1.442695, %v223_v24 }
 0x10e   :  { %568 = vpow2.f32 %v233_v2  ;;  %v218_v6 = vmin.f32 %v493_v4, 0.0  ;;  %v146_v7 = vpop.f32.mrb[3].mxu0  ;;  %v186_v8 = vpop.f32.mrb[3].mxu1  ;;  %v226_v41 = vmin.f32 %v505_v5, 0.0 }
 0x10f   :  { %v217_v9 = vmin.f32 %v146_v7, 0.0  ;;  %570 = vpow2.f32 %v231_v3  ;;  %v225_v38 = vmin.f32 %v186_v8, 0.0  ;;  %v330_v3 = vpop.permute.xlu1 %329 }
 0x110   :  { %v237_v11 = vmul.f32 1.442695, %v218_v6  ;;  %v253_v50 = vmul.f32 1.442695, %v226_v41 }
 0x111   :  { %v235_v12 = vmul.f32 1.442695, %v217_v9  ;;  %v496_v13 = vpop.f32.mrb[4].mxu0  ;;  %v508_v14 = vpop.f32.mrb[4].mxu1  ;;  %v251_v46 = vmul.f32 1.442695, %v225_v38 }
 0x112   :  { %v220_v15 = vmin.f32 %v496_v13, 0.0  ;;  %v156_v16 = vpop.f32.mrb[5].mxu0  ;;  %v196_v17 = vpop.f32.mrb[5].mxu1  ;;  %572 = vpow2.f32 %v237_v11  ;;  %v228_v51 = vmin.f32 %v508_v14, 0.0 }
 0x113   :  { %v219_v18 = vmin.f32 %v156_v16, 0.0  ;;  %574 = vpow2.f32 %v235_v12  ;;  %v227_v47 = vmin.f32 %v196_v17, 0.0  ;;  %v335_v12 = vpop.permute.xlu0 %334  ;;  %v340_v16 = vpop.permute.xlu1 %339 }
 0x114   :  { %v241_v20 = vmul.f32 1.442695, %v220_v15  ;;  %v257_v61 = vmul.f32 1.442695, %v228_v51 }
 0x115   :  { %v239_v21 = vmul.f32 1.442695, %v219_v18  ;;  %v499_v22 = vpop.f32.mrb[6].mxu0  ;;  %v511_v23 = vpop.f32.mrb[6].mxu1  ;;  %v255_v56 = vmul.f32 1.442695, %v227_v47 }
 0x116   :  { %v222_v25 = vmin.f32 %v499_v22, 0.0  ;;  %v166_v26 = vpop.f32.mrb[7].mxu0  ;;  %v206_v27 = vpop.f32.mrb[7].mxu1  ;;  %576 = vpow2.f32 %v241_v20  ;;  %v230_v62 = vmin.f32 %v511_v23, 0.0 }
 0x117   :  { %v221_v28 = vmin.f32 %v166_v26, 0.0  ;;  %578 = vpow2.f32 %v239_v21  ;;  %v229_v57 = vmin.f32 %v206_v27, 0.0  ;;  %v345_v23 = vpop.permute.xlu0 %344  ;;  %v350_v27 = vpop.permute.xlu1 %349 }
 0x118   :  { %v569_v29 = vpop.eup %568  ;;  %v245_v32 = vmul.f32 1.442695, %v222_v25  ;;  %v261_v8 = vmul.f32 1.442695, %v230_v62 }
 0x119   :  { %v363_v33 = vmul.f32 %v569_v29, %v290_v10  ;;  %v243_v34 = vmul.f32 1.442695, %v221_v28  ;;  %v571_v35 = vpop.eup %570  ;;  %v259_v4 = vmul.f32 1.442695, %v229_v57 }
 0x11a   :  { %v362_v39 = vmul.f32 %v571_v35, %v285_v58  ;;  %580 = vpow2.f32 %v245_v32 }
 0x11b   :  { %582 = vpow2.f32 %v243_v34  ;;  %v355_v34 = vpop.permute.xlu0 %354 }
 0x11c   :  { %v573_v42 = vpop.eup %572  ;;  %v378_v43 = vadd.f32 %v363_v33, %v362_v39  ;;  %584 = vpow2.f32 %v247_v37  ;;  %v360_v37 = vpop.permute.xlu1 %359 }
 0x11d   :  { %v575_v44 = vpop.eup %574  ;;  %586 = vpow2.f32 %v249_v40  ;;  %v365_v53 = vmul.f32 %v573_v42, %v300_v19 }
 0x11e   :  { %v364_v48 = vmul.f32 %v575_v44, %v295_v1  ;;  %588 = vpow2.f32 %v251_v46  ;;  %v281_v46 = vld [vmem:[#allocation6] sm:$0x1] }
 0x11f   :  { %590 = vpow2.f32 %v253_v50 }
 0x120   :  { %v577_v52 = vpop.eup %576  ;;  %v379_v54 = vadd.f32 %v378_v43, %v364_v48  ;;  %592 = vpow2.f32 %v255_v56 }
 0x121   :  { %v579_v55 = vpop.eup %578  ;;  %v367_v0 = vmul.f32 %v577_v52, %v310_v36  ;;  %594 = vpow2.f32 %v257_v61 }
 0x122   :  { %v366_v58 = vmul.f32 %v579_v55, %v305_v30  ;;  %v380_v59 = vadd.f32 %v379_v54, %v365_v53  ;;  %596 = vpow2.f32 %v259_v4 }
 0x123   :  { %598 = vpow2.f32 %v261_v8 }
 0x124   :  { %v581_v63 = vpop.eup %580  ;;  %v381_v1 = vadd.f32 %v380_v59, %v366_v58 }
 0x125   :  { %v583_v2 = vpop.eup %582  ;;  %v369_v9 = vmul.f32 %v581_v63, %v320_v49  ;;  %v406_v49 = vstv %s805_s3 }
 0x126   :  { %v368_v5 = vmul.f32 %v583_v2, %v315_v45  ;;  %v382_v6 = vadd.f32 %v381_v1, %v367_v0  ;;  %v585_v7 = vpop.eup %584 }
 0x127   :  { %v587_v11 = vpop.eup %586  ;;  %v370_v13 = vmul.f32 %v585_v7, %v325_v60 }
 0x128   :  { %v383_v10 = vadd.f32 %v382_v6, %v368_v5  ;;  %v589_v15 = vpop.eup %588  ;;  %v371_v17 = vmul.f32 %v587_v11, %v330_v3 }
 0x129   :  { %v591_v19 = vpop.eup %590  ;;  %v372_v20 = vmul.f32 %v589_v15, %v335_v12 }
 0x12a   :  { %v384_v14 = vadd.f32 %v383_v10, %v369_v9  ;;  %v593_v22 = vpop.eup %592  ;;  %v373_v24 = vmul.f32 %v591_v19, %v340_v16 }
 0x12b   :  { %v595_v26 = vpop.eup %594  ;;  %v374_v28 = vmul.f32 %v593_v22, %v345_v23 }
 0x12c   :  { %v385_v18 = vadd.f32 %v384_v14, %v370_v13  ;;  %v597_v30 = vpop.eup %596  ;;  %v375_v31 = vmul.f32 %v595_v26, %v350_v27 }
 0x12d   :  { %v599_v33 = vpop.eup %598  ;;  %v376_v36 = vmul.f32 %v597_v30, %v355_v34 }
 0x12e   :  { %v386_v21 = vadd.f32 %v385_v18, %v371_v17  ;;  %v377_v39 = vmul.f32 %v599_v33, %v360_v37 }
 0x130   :  { %v387_v25 = vadd.f32 %v386_v21, %v372_v20 }
 0x132   :  { %v388_v29 = vadd.f32 %v387_v25, %v373_v24 }
 0x134   :  { %v389_v32 = vadd.f32 %v388_v29, %v374_v28 }
 0x136   :  { %v390_v35 = vadd.f32 %v389_v32, %v375_v31 }
 0x138   :  { %v391_v38 = vadd.f32 %v390_v35, %v376_v36 }
 0x13a   :  { %v392_v40 = vadd.f32 %v391_v38, %v377_v39 }
 0x13c   :  { %v393_v41 = vrot.slane %v392_v40, 4 }
 0x13e   :  { %v394_v42 = vadd.f32 %v393_v41, %v392_v40 }
 0x140   :  { %v395_v43 = vrot.slane %v394_v42, 2 }
 0x142   :  { %v396_v44 = vadd.f32 %v395_v43, %v394_v42 }
 0x144   :  { %v397_v45 = vrot.slane %v396_v44, 1 }
 0x146   :  { %v398_v47 = vadd.f32 %v397_v45, %v396_v44 }
 0x148   :  { %v399_v48 = vadd.f32 %v398_v47, %v281_v46 }
 0x14a   :  { %400 = vst [vmem:[#allocation6] sm:$0x1] %v399_v48 }
 0x151   :  { %v404_v50 = vld [vmem:[#allocation6] sm:$0x1] }
 0x152   :  { %v407_v51 = vadd.f32 %v406_v49, %v404_v50 }
 0x154   :  { %408 = vst [vmem:[#allocation6] sm:$0x1] %v407_v51 }
 0x155   :  { %633 = shalt.err (!%p630_p12)
}
 0x156   :  { %s634_s18 = scalar_lea.hbm %s806_s4, 16 }
 0x157   :  { %p635_p13 = scmp.ne.s32.totalorder %s806_s4, %s634_s18  ;;  %p638_p0 = scmp.lt.u32.totalorder %s634_s18, %s806_s4 }
 0x159   :  { %p640_p1 = pnand %p638_p0, %p635_p13 }
 0x15b   :  { %643 = shalt.err (!%p640_p1)
}
 0x15c   :  { %418 = dma.vmem_to_hbm [thread:$0]  %s416_s13, 16, %s806_s4, [#allocation5]  }
 0x15d   :  { %646 = dma.done.wait [#allocation5], 16  }
 0x15e   :  { %647 = vsyncadd [#allocation5], 4294967280 }
 0x15f   :  { %422 = vsyncpa [#allocation4], 1 }
 0x160   :  { %423 = vsyncpa [#allocation5], 1 }

</bundles_post_ra>
